<compile_context>
chip_gen: v7x
topology: tpu7x:2x2x1
jax: 0.10.0
libtpu: 0.0.40
codegen_flags: <defaults>
</compile_context>

<pallas_src>
import math

import jax
import jax.numpy as jnp
from jax.experimental import pallas as pl
from jax.experimental.pallas import tpu as pltpu

LOG_SQRT_2PI = 0.5 * math.log(2.0 * math.pi)


# ----------------------------------------------------------------------------
# Pallas kernel: one batch tile (TM lanes) per grid step, weights resident.
# ----------------------------------------------------------------------------
def actor_kernel(
    logp_bias_ref,   # SMEM (1,)   f32 : sum(logstd) + A*log(sqrt(2*pi))
    x_ref,           # (D_in, TM)  bf16: state^T tile (batch on lanes)
    w1_ref,          # (H1, D_in)  bf16
    b1_ref,          # (H1, 1)     f32
    w2_ref,          # (H2, H1)    bf16
    b2_ref,          # (H2, 1)     f32
    w3_ref,          # (A, H2)     bf16
    b3_ref,          # (A, 1)      f32
    std_ref,         # (A, 1)      f32 : exp(logstd), precomputed in wrapper
    noise_ref,       # (A, TM)     f32 : standard-normal eps (dist.sample())
    out_ref,         # out: (A+1, TM) f32 : rows [0,A)=action^T, row A=log_prob
):
    A = std_ref.shape[0]

    # --- MLP in transposed orientation: h^T = W^T @ x^T  (bf16 MXU, f32 acc) ---
    h = jnp.dot(w1_ref[...], x_ref[...],
                preferred_element_type=jnp.float32) + b1_ref[...]
    h = jnp.maximum(h, 0.0)
    h = jnp.dot(w2_ref[...], h.astype(jnp.bfloat16),
                preferred_element_type=jnp.float32) + b2_ref[...]
    h = jnp.maximum(h, 0.0)
    mean = jnp.dot(w3_ref[...], h.astype(jnp.bfloat16),
                   preferred_element_type=jnp.float32) + b3_ref[...]   # (A, TM)

    noise = noise_ref[...]                                             # (A, TM)

    # dist.sample(): action = mean + std * eps
    action_t = mean + std_ref[...] * noise

    # log_prob: (action - mean) == std * eps  =>
    #   sum_A log N(action | mean, std) = -0.5*sum(eps^2) - (sum(logstd) + A*log sqrt(2pi))
    logp = -0.5 * jnp.sum(noise * noise, axis=0, keepdims=True) - logp_bias_ref[0]

    out_ref[:A, :] = action_t            # lane-dense, unmasked stores
    out_ref[A:, :] = logp


# ----------------------------------------------------------------------------
# Wrapper
# ----------------------------------------------------------------------------
def actor_forward(state, params, noise, *, block_cols=2048):
    """Actor forward pass. Returns (action (B,A), log_prob (B,), entropy (B,))."""
    B, D_in = state.shape
    A = params["w3_t"].shape[0]
    lane = 128

    # --- batch tiling (batch lives on the lane axis) -------------------------
    block_cols = max(lane, (block_cols // lane) * lane)
    b_lanes = pl.cdiv(B, lane) * lane                 # batch rounded to lane width
    TM = min(block_cols, b_lanes)
    # For large batches keep >= 2 grid steps so "parallel" can shard tiles
    # across both TensorCores (v7x); never shrink below 512 lanes per tile.
    if b_lanes >= 1024 and b_lanes // TM < 2:
        TM = max(512, ((b_lanes // 2) // lane) * lane)
    B_pad = pl.cdiv(b_lanes, TM) * TM
    grid = (B_pad // TM,)

    # --- batch-as-lanes inputs (bf16 state halves the dominant input DMA) ----
    x_t = jnp.pad(state.astype(jnp.bfloat16).T, ((0, 0), (0, B_pad - B)))
    n_t = jnp.pad(noise.astype(jnp.float32).T, ((0, 0), (0, B_pad - B)))

    # --- batch-constant math hoisted out of the kernel ------------------------
    logstd = params["logstd"]                               # (1, A) f32
    sum_logstd = jnp.sum(logstd)
    std_t = jnp.exp(logstd).reshape(A, 1).astype(jnp.float32)
    logp_bias = (sum_logstd + A * LOG_SQRT_2PI).reshape(1).astype(jnp.float32)
    entropy = jnp.broadcast_to(
        A * (0.5 + LOG_SQRT_2PI) + sum_logstd, (B,)).astype(jnp.float32)

    stream_spec = lambda rows: pl.BlockSpec((rows, TM), lambda i: (0, i))
    resident_spec = lambda shp: pl.BlockSpec(shp, lambda i: (0, 0))

    out_t = pl.pallas_call(
        actor_kernel,
        out_shape=jax.ShapeDtypeStruct((A + 1, B_pad), jnp.float32),
        grid=grid,
        in_specs=[
            pl.BlockSpec(memory_space=pltpu.MemorySpace.SMEM),   # logp_bias scalar
            stream_spec(D_in),                                   # state^T
            resident_spec(params["w1_t"].shape),
            resident_spec(params["b1"].shape),
            resident_spec(params["w2_t"].shape),
            resident_spec(params["b2"].shape),
            resident_spec(params["w3_t"].shape),
            resident_spec(params["b3"].shape),
            resident_spec((A, 1)),                               # std
            stream_spec(A),                                      # noise^T
        ],
        out_specs=pl.BlockSpec((A + 1, TM), lambda i: (0, i)),   # lane-dense slab
        compiler_params=pltpu.CompilerParams(
            dimension_semantics=("parallel",)),
    )(
        logp_bias, x_t,
        params["w1_t"], params["b1"],
        params["w2_t"], params["b2"],
        params["w3_t"], params["b3"],
        std_t, n_t,
    )

    action = out_t[:A, :B].T        # (B, A)
    log_prob = out_t[A, :B]         # (B,)
    return action, log_prob, entropy


# ----------------------------------------------------------------------------
# Deterministic parameter init (Xavier-uniform, as in init_xavier_uniform).
# Weights stored pre-transposed in bf16 (MXU-native); biases / logstd in f32.
# ----------------------------------------------------------------------------
def init_params(key, in_dim, hidden_dims, action_dim, action_std_init, init_scaling):
    dims = [in_dim] + list(hidden_dims) + [action_dim]
    params = {}
    for i, (d_in, d_out) in enumerate(zip(dims[:-1], dims[1:]), start=1):
        key, kw = jax.random.split(key)
        bound = init_scaling * math.sqrt(6.0 / (d_in + d_out))
        w = jax.random.uniform(kw, (d_in, d_out), jnp.float32,
                               minval=-bound, maxval=bound)
        params[f"w{i}_t"] = w.T.astype(jnp.bfloat16)       # (d_out, d_in)
        params[f"b{i}"] = jnp.zeros((d_out, 1), jnp.float32)
    params["logstd"] = jnp.full((1, action_dim), math.log(action_std_init),
                                jnp.float32)
    return params


# ----------------------------------------------------------------------------
# Main
# ----------------------------------------------------------------------------
if __name__ == "__main__":
    STATE_DIM, GOAL_DIM, ACTION_DIM = 10, 6, 4
    HIDDEN_DIMS = (32, 32)
    ACTION_STD_INIT = 0.6
    INIT_SCALING = 1.0
    BATCH = 8
    IN_DIM = STATE_DIM + GOAL_DIM

    key = jax.random.PRNGKey(0)
    k_params, k_state, k_noise = jax.random.split(key, 3)

    params = init_params(
        k_params, IN_DIM, HIDDEN_DIMS, ACTION_DIM, ACTION_STD_INIT, INIT_SCALING
    )

    # `state` already contains the concatenated (state, goal) features.
    state = jax.random.normal(k_state, (BATCH, IN_DIM), jnp.float32)
    # dist.sample() noise drawn in the wrapper (glue) for determinism.
    noise = jax.random.normal(k_noise, (BATCH, ACTION_DIM), jnp.float32)

    action, log_prob, entropy = actor_forward(state, params, noise)
    jax.block_until_ready((action, log_prob, entropy))

    # --- Pure-JAX reference (PyTorch-form math, same bf16 rounding points) ---
    w1 = params["w1_t"].astype(jnp.float32).T
    w2 = params["w2_t"].astype(jnp.float32).T
    w3 = params["w3_t"].astype(jnp.float32).T
    b1, b2, b3 = params["b1"].T, params["b2"].T, params["b3"].T
    xr = state.astype(jnp.bfloat16).astype(jnp.float32)
    h = jnp.maximum(xr @ w1 + b1, 0.0)
    h = jnp.maximum(h.astype(jnp.bfloat16).astype(jnp.float32) @ w2 + b2, 0.0)
    mean = h.astype(jnp.bfloat16).astype(jnp.float32) @ w3 + b3
    std = jnp.exp(params["logstd"])
    ref_action = mean + std * noise
    ref_logp = jnp.sum(
        -((ref_action - mean) ** 2) / (2.0 * std ** 2)
        - params["logstd"] - LOG_SQRT_2PI,
        axis=-1,
    )
    ref_ent = jnp.sum(
        jnp.broadcast_to(0.5 + LOG_SQRT_2PI + params["logstd"], mean.shape),
        axis=-1,
    )

    assert jnp.allclose(action, ref_action, atol=1e-4, rtol=1e-4)
    assert jnp.allclose(log_prob, ref_logp, atol=1e-4, rtol=1e-4)
    assert jnp.allclose(entropy, ref_ent, atol=1e-5)

    print("KERNEL_OK")
</pallas_src>

<mosaic_0001>
module attributes {stable_mosaic.version = 11 : i64} {
  func.func @actor_kernel(%arg0: i32, %arg1: memref<1xf32, #tpu.memory_space<smem>>, %arg2: memref<16x128xbf16, #tpu.memory_space<vmem>>, %arg3: memref<32x16xbf16, #tpu.memory_space<vmem>>, %arg4: memref<32x1xf32, #tpu.memory_space<vmem>>, %arg5: memref<32x32xbf16, #tpu.memory_space<vmem>>, %arg6: memref<32x1xf32, #tpu.memory_space<vmem>>, %arg7: memref<4x32xbf16, #tpu.memory_space<vmem>>, %arg8: memref<4x1xf32, #tpu.memory_space<vmem>>, %arg9: memref<4x1xf32, #tpu.memory_space<vmem>>, %arg10: memref<4x128xf32, #tpu.memory_space<vmem>>, %arg11: memref<5x128xf32, #tpu.memory_space<vmem>>) attributes {dimension_semantics = [#tpu.dimension_semantics<parallel>], iteration_bounds = array<i64: 1>, scalar_prefetch = 0 : i64, scratch_operands = 0 : i64, tpu.core_type = #tpu.core_type<tc>, window_params = [{transform_indices = @transform_0, window_bounds = array<i64: 1>}, {transform_indices = @transform_1, window_bounds = array<i64: 16, 128>}, {pipeline_mode = #tpu.pipeline_mode<synchronous>, transform_indices = @transform_2, window_bounds = array<i64: 32, 16>}, {pipeline_mode = #tpu.pipeline_mode<synchronous>, transform_indices = @transform_3, window_bounds = array<i64: 32, 1>}, {pipeline_mode = #tpu.pipeline_mode<synchronous>, transform_indices = @transform_4, window_bounds = array<i64: 32, 32>}, {pipeline_mode = #tpu.pipeline_mode<synchronous>, transform_indices = @transform_5, window_bounds = array<i64: 32, 1>}, {pipeline_mode = #tpu.pipeline_mode<synchronous>, transform_indices = @transform_6, window_bounds = array<i64: 4, 32>}, {pipeline_mode = #tpu.pipeline_mode<synchronous>, transform_indices = @transform_7, window_bounds = array<i64: 4, 1>}, {pipeline_mode = #tpu.pipeline_mode<synchronous>, transform_indices = @transform_8, window_bounds = array<i64: 4, 1>}, {transform_indices = @transform_9, window_bounds = array<i64: 4, 128>}, {transform_indices = @transform_10, window_bounds = array<i64: 5, 128>}]} {
    %c0 = arith.constant 0 : index
    %c0_0 = arith.constant 0 : index
    %0 = vector.load %arg3[%c0, %c0_0] : memref<32x16xbf16, #tpu.memory_space<vmem>>, vector<32x16xbf16>
    %c0_1 = arith.constant 0 : index
    %c0_2 = arith.constant 0 : index
    %1 = vector.load %arg2[%c0_1, %c0_2] : memref<16x128xbf16, #tpu.memory_space<vmem>>, vector<16x128xbf16>
    %cst = arith.constant dense<0.000000e+00> : vector<32x128xf32>
    %2 = tpu.matmul %0, %1, %cst {dimension_numbers = #tpu.dot_dimension_numbers<[1], [0], [0], [1], [0, 0, 1, 1], [], []>} : vector<32x16xbf16>, vector<16x128xbf16>, vector<32x128xf32> -> vector<32x128xf32>
    %c0_3 = arith.constant 0 : index
    %c0_4 = arith.constant 0 : index
    %3 = vector.load %arg4[%c0_3, %c0_4] : memref<32x1xf32, #tpu.memory_space<vmem>>, vector<32x1xf32>
    %4 = vector.broadcast %3 : vector<32x1xf32> to vector<32x128xf32>
    %5 = arith.addf %2, %4 : vector<32x128xf32>
    %cst_5 = arith.constant 0.000000e+00 : f32
    %6 = vector.broadcast %cst_5 : f32 to vector<32x128xf32>
    %7 = arith.maximumf %5, %6 : vector<32x128xf32>
    %c0_6 = arith.constant 0 : index
    %c0_7 = arith.constant 0 : index
    %8 = vector.load %arg5[%c0_6, %c0_7] : memref<32x32xbf16, #tpu.memory_space<vmem>>, vector<32x32xbf16>
    %9 = arith.truncf %7 : vector<32x128xf32> to vector<32x128xbf16>
    %cst_8 = arith.constant dense<0.000000e+00> : vector<32x128xf32>
    %10 = tpu.matmul %8, %9, %cst_8 {dimension_numbers = #tpu.dot_dimension_numbers<[1], [0], [0], [1], [0, 0, 1, 1], [], []>} : vector<32x32xbf16>, vector<32x128xbf16>, vector<32x128xf32> -> vector<32x128xf32>
    %c0_9 = arith.constant 0 : index
    %c0_10 = arith.constant 0 : index
    %11 = vector.load %arg6[%c0_9, %c0_10] : memref<32x1xf32, #tpu.memory_space<vmem>>, vector<32x1xf32>
    %12 = vector.broadcast %11 : vector<32x1xf32> to vector<32x128xf32>
    %13 = arith.addf %10, %12 : vector<32x128xf32>
    %cst_11 = arith.constant 0.000000e+00 : f32
    %14 = vector.broadcast %cst_11 : f32 to vector<32x128xf32>
    %15 = arith.maximumf %13, %14 : vector<32x128xf32>
    %c0_12 = arith.constant 0 : index
    %c0_13 = arith.constant 0 : index
    %16 = vector.load %arg7[%c0_12, %c0_13] : memref<4x32xbf16, #tpu.memory_space<vmem>>, vector<4x32xbf16>
    %17 = arith.truncf %15 : vector<32x128xf32> to vector<32x128xbf16>
    %cst_14 = arith.constant dense<0.000000e+00> : vector<4x128xf32>
    %18 = tpu.matmul %16, %17, %cst_14 {dimension_numbers = #tpu.dot_dimension_numbers<[1], [0], [0], [1], [0, 0, 1, 1], [], []>} : vector<4x32xbf16>, vector<32x128xbf16>, vector<4x128xf32> -> vector<4x128xf32>
    %c0_15 = arith.constant 0 : index
    %c0_16 = arith.constant 0 : index
    %19 = vector.load %arg8[%c0_15, %c0_16] : memref<4x1xf32, #tpu.memory_space<vmem>>, vector<4x1xf32>
    %20 = vector.broadcast %19 : vector<4x1xf32> to vector<4x128xf32>
    %21 = arith.addf %18, %20 : vector<4x128xf32>
    %c0_17 = arith.constant 0 : index
    %c0_18 = arith.constant 0 : index
    %22 = vector.load %arg10[%c0_17, %c0_18] : memref<4x128xf32, #tpu.memory_space<vmem>>, vector<4x128xf32>
    %c0_19 = arith.constant 0 : index
    %c0_20 = arith.constant 0 : index
    %23 = vector.load %arg9[%c0_19, %c0_20] : memref<4x1xf32, #tpu.memory_space<vmem>>, vector<4x1xf32>
    %24 = vector.broadcast %23 : vector<4x1xf32> to vector<4x128xf32>
    %25 = arith.mulf %24, %22 : vector<4x128xf32>
    %26 = arith.addf %21, %25 : vector<4x128xf32>
    %27 = arith.mulf %22, %22 : vector<4x128xf32>
    %cst_21 = arith.constant dense<0.000000e+00> : vector<128xf32>
    %28 = vector.multi_reduction <add>, %27, %cst_21 [0] : vector<4x128xf32> to vector<128xf32>
    %29 = vector.shape_cast %28 : vector<128xf32> to vector<1x128xf32>
    %cst_22 = arith.constant -5.000000e-01 : f32
    %30 = vector.broadcast %cst_22 : f32 to vector<1x128xf32>
    %31 = arith.mulf %30, %29 : vector<1x128xf32>
    %c0_23 = arith.constant 0 : index
    %32 = memref.load %arg1[%c0_23] : memref<1xf32, #tpu.memory_space<smem>>
    %33 = vector.broadcast %32 : f32 to vector<1x128xf32>
    %34 = arith.subf %31, %33 : vector<1x128xf32>
    %c0_24 = arith.constant 0 : index
    %c0_25 = arith.constant 0 : index
    %35 = vector.load %arg11[%c0_24, %c0_25] : memref<5x128xf32, #tpu.memory_space<vmem>>, vector<4x128xf32>
    tpu.vector_store %arg11[%c0_24, %c0_25], %26 {strides = array<i32>} : memref<5x128xf32, #tpu.memory_space<vmem>>, vector<4x128xf32>,
    %c4 = arith.constant 4 : index
    %c0_26 = arith.constant 0 : index
    %36 = vector.load %arg11[%c4, %c0_26] : memref<5x128xf32, #tpu.memory_space<vmem>>, vector<1x128xf32>
    tpu.vector_store %arg11[%c4, %c0_26], %34 {strides = array<i32>} : memref<5x128xf32, #tpu.memory_space<vmem>>, vector<1x128xf32>,
    return
  }
  func.func @transform_0(%arg0: i32) -> i32 {
    %c0_i32 = arith.constant 0 : i32
    %c0_i32_0 = arith.constant 0 : i32
    return %c0_i32 : i32
  }
  func.func @transform_1(%arg0: i32) -> (i32, i32) {
    %c0_i32 = arith.constant 0 : i32
    %c0_i32_0 = arith.constant 0 : i32
    return %c0_i32, %arg0 : i32, i32
  }
  func.func @transform_2(%arg0: i32) -> (i32, i32) {
    %c0_i32 = arith.constant 0 : i32
    %c0_i32_0 = arith.constant 0 : i32
    %c0_i32_1 = arith.constant 0 : i32
    return %c0_i32, %c0_i32_0 : i32, i32
  }
  func.func @transform_3(%arg0: i32) -> (i32, i32) {
    %c0_i32 = arith.constant 0 : i32
    %c0_i32_0 = arith.constant 0 : i32
    %c0_i32_1 = arith.constant 0 : i32
    return %c0_i32, %c0_i32_0 : i32, i32
  }
  func.func @transform_4(%arg0: i32) -> (i32, i32) {
    %c0_i32 = arith.constant 0 : i32
    %c0_i32_0 = arith.constant 0 : i32
    %c0_i32_1 = arith.constant 0 : i32
    return %c0_i32, %c0_i32_0 : i32, i32
  }
  func.func @transform_5(%arg0: i32) -> (i32, i32) {
    %c0_i32 = arith.constant 0 : i32
    %c0_i32_0 = arith.constant 0 : i32
    %c0_i32_1 = arith.constant 0 : i32
    return %c0_i32, %c0_i32_0 : i32, i32
  }
  func.func @transform_6(%arg0: i32) -> (i32, i32) {
    %c0_i32 = arith.constant 0 : i32
    %c0_i32_0 = arith.constant 0 : i32
    %c0_i32_1 = arith.constant 0 : i32
    return %c0_i32, %c0_i32_0 : i32, i32
  }
  func.func @transform_7(%arg0: i32) -> (i32, i32) {
    %c0_i32 = arith.constant 0 : i32
    %c0_i32_0 = arith.constant 0 : i32
    %c0_i32_1 = arith.constant 0 : i32
    return %c0_i32, %c0_i32_0 : i32, i32
  }
  func.func @transform_8(%arg0: i32) -> (i32, i32) {
    %c0_i32 = arith.constant 0 : i32
    %c0_i32_0 = arith.constant 0 : i32
    %c0_i32_1 = arith.constant 0 : i32
    return %c0_i32, %c0_i32_0 : i32, i32
  }
  func.func @transform_9(%arg0: i32) -> (i32, i32) {
    %c0_i32 = arith.constant 0 : i32
    %c0_i32_0 = arith.constant 0 : i32
    return %c0_i32, %arg0 : i32, i32
  }
  func.func @transform_10(%arg0: i32) -> (i32, i32) {
    %c0_i32 = arith.constant 0 : i32
    %c0_i32_0 = arith.constant 0 : i32
    return %c0_i32, %arg0 : i32, i32
  }
}

</mosaic_0001>

<bundles_post_ra>
// kernel: tpu_custom_call.1
= control target key start
LH: loop header
LB: loop body
LE: loop exit
PB: predicated region body
PF: predicated region fallthrough
CT: control target
= control target key end

     0   :  { %vm84_vm0 = vcmask 130048   ;;  %v411_v3 = vmov 0   ;;  %s539_s0 = inlined_call_operand.<no memory space> [shape: f32[1], index: 0, kind: input, shape index: {}]   ;;  %s540_s1 = inlined_call_operand.vmem [shape: bf16[16,128], index: 1, kind: input, shape index: {}]   ;;  %s541_s2 = inlined_call_operand.vmem [shape: bf16[32,16], index: 2, kind: input, shape index: {}]   ;;  %s542_s3 = inlined_call_operand.vmem [shape: f32[32,1], index: 3, kind: input, shape index: {}]   ;;  %s543_s4 = inlined_call_operand.vmem [shape: bf16[32,32], index: 4, kind: input, shape index: {}]   ;;  %s544_s5 = inlined_call_operand.vmem [shape: f32[32,1], index: 5, kind: input, shape index: {}]   ;;  %s545_s6 = inlined_call_operand.vmem [shape: bf16[4,32], index: 6, kind: input, shape index: {}]   ;;  %s546_s7 = inlined_call_operand.vmem [shape: f32[4,1], index: 7, kind: input, shape index: {}]   ;;  %s547_s8 = inlined_call_operand.vmem [shape: f32[4,1], index: 8, kind: input, shape index: {}]   ;;  %s548_s9 = inlined_call_operand.vmem [shape: f32[4,128], index: 9, kind: input, shape index: {}]   ;;  %s549_s10 = inlined_call_operand.hbm [shape: f32[5,128], index: 10, kind: output, shape index: {}]  }
   0x1   :  { %v382_v0 = vld [vmem:[%s540_s1] sm:$0xff]   ;;  %v384_v2 = vld [vmem:[%s541_s2 + $0x8] sm:$0xff]   ;;  %380 = vset.pattern.permute.xlu0 %v411_v3  ;;  %v46_v5 = vld [vmem:[%s542_s3 + $0x10] sm:$0xff]  ;;  %381 = vset.pattern.permute.xlu1 %v411_v3 }
   0x2   :  { %v383_v1 = vld [vmem:[%s541_s2] sm:$0xff]   ;;  %354 = vmatprep.subr.bf16.mxu0 %v382_v0  ;;  %60 = vperm.xlu1 %381, %v46_v5   ;;  %v45_v6 = vld [vmem:[%s542_s3 + $0x8] sm:$0xff]  ;;  %v47_v7 = vld [vmem:[%s542_s3 + $0x18] sm:$0xff] }
   0x3   :  { %355 = vmatpush3.bf16.msra.mxu0 %v382_v0  ;;  %356 = vmatprep.mubr.msk.bf16.mxu0 %vm84_vm0, %v383_v1  ;;  %v44_v4 = vld [vmem:[%s542_s3] sm:$0xff] }
   0x4   :  { %50 = vperm.xlu0 %380, %v44_v4  }
   0x6   :  { %357 = vmatmul.mubr.msk.bf16.vlgmr.msra.gmra.mrb[0].mxu0 %vm84_vm0, %v384_v2 }
   0x7   :  { %16 = vsyncpa [#allocation4], 0  ;;  %65 = vperm.xlu1 %381, %v47_v7   ;;  %v150_v8 = vld [vmem:[%s544_s5] sm:$0xff]  ;;  %v151_v9 = vld [vmem:[%s544_s5 + $0x8] sm:$0xff]  ;;  %vm184_vm1 = vcmask 261120   ;;  %v412_v34 = vmov 0.0   ;;  %v316_v0 = vstv %s539_s0 }
   0x8   :  { %55 = vperm.xlu0 %380, %v45_v6   ;;  %v152_v10 = vld [vmem:[%s544_s5 + $0x10] sm:$0xff]  ;;  %v153_v11 = vld [vmem:[%s544_s5 + $0x18] sm:$0xff]  ;;  %v247_v12 = vld [vmem:[%s546_s7] sm:$0xf]  ;;  %368 = vmatprep.subr.bf16.mxu0 %v412_v34  ;;  %vm413_vm2 = vmmov 0   ;;  %vm306_vm3 = vcmask 1043456  }
   0x9   :  { %v297_v13 = vld [vmem:[%s547_s8] sm:$0xf]  ;;  %v386_v33 = vld [vmem:[%s543_s4 + $0x8] sm:$0xff]   ;;  %372 = vmatprep.mubr.msk.bf16.mxu0 %vm413_vm2, %v412_v34 }
   0xa   :  { %v385_v14 = vld [vmem:[%s543_s4] sm:$0xff]  }
   0xb   :  { %161 = vperm.xlu1 %381, %v151_v9   ;;  %364 = vmatprep.mubr.msk.bf16.mxu1 %vm184_vm1, %v385_v14  ;;  %v244_v53 = vld [vmem:[%s545_s6] sm:$0x3]  ;;  %s414_s6 = smov [#allocation3]  }
   0xc   :  { %156 = vperm.xlu0 %380, %v150_v8   ;;  %v296_v54 = vld [vmem:[%s548_s9] sm:$0xf]  ;;  %s326_s9 = sshll.u32 %s414_s6, 4  ;;  %s327_s9 = int_to_ptr.vmem [resolvable:$true] %s326_s9 }
   0xd   :  { %v305_v55 = vmul.f32 %v296_v54, %v296_v54  ;;  %s387_s1 = scalar_lea.vmem %s327_s9, 128  ;;  %p392_p1 = scmp.lt.s32.totalorder %s327_s9, %s327_s9 }
   0xe   :  { %p388_p0 = scmp.ne.s32.totalorder %s327_s9, %s387_s1  ;;  %p393_p2 = scmp.lt.s32.totalorder %s387_s1, %s387_s1 }
   0xf   :  { %171 = vperm.xlu1 %381, %v153_v11   ;;  %v307_v56 = vsel %vm306_vm3, %v305_v55, 0.0 }
  0x10   :  { %166 = vperm.xlu0 %380, %v152_v10   ;;  %v308_v57 = vrot.slane %v307_v56, 4  ;;  %p394_p3 = por %p393_p2, %p392_p1 }
  0x12   :  { %v309_v58 = vadd.f32 %v308_v57, %v307_v56  ;;  %p395_p4 = pnand %p394_p3, %p388_p0 }
  0x13   :  { %300 = vperm.xlu1 %381, %v297_v13  }
  0x14   :  { %250 = vperm.xlu0 %380, %v247_v12   ;;  %v310_v59 = vrot.slane %v309_v58, 2 }
  0x16   :  { %v311_v60 = vadd.f32 %v310_v59, %v309_v58 }
  0x18   :  { %v312_v61 = vrot.slane %v311_v60, 1 }
  0x1a   :  { %v313_v62 = vadd.f32 %v312_v61, %v311_v60 }
  0x1c   :  { %v314_v63 = vmul.f32 -0.5, %v313_v62 }
  0x1e   :  { %v317_v1 = vsub.f32 %v314_v63, %v316_v0 }
  0x20   :  { %319 = vst [vmem:[#allocation3 + $0x4] sm:$0x1] %v317_v1 }
  0x81   :  { %v61_v15 = vpop.permute.xlu1 %60 }
  0x83   :  { %v51_v16 = vpop.permute.xlu0 %50 }
  0x86   :  { %v66_v20 = vpop.permute.xlu1 %65 }
  0x87   :  { %v56_v23 = vpop.permute.xlu0 %55 }
  0x8a   :  { %v162_v36 = vpop.permute.xlu1 %161 }
  0x8b   :  { %v157_v35 = vpop.permute.xlu0 %156 }
  0x8e   :  { %v172_v41 = vpop.permute.xlu1 %171 }
  0x8f   :  { %v167_v37 = vpop.permute.xlu0 %166 }
  0x92   :  { %v301_v2 = vpop.permute.xlu1 %300 }
  0x93   :  { %v251_v3 = vpop.permute.xlu0 %250  ;;  %v303_v5 = vmul.f32 %v301_v2, %v296_v54 }
  0xd9   :  { %v358_v17 = vpop.f32.mrb[0].mxu0 }
  0xda   :  { %v134_v18 = vadd.f32 %v358_v17, %v61_v15  ;;  %v125_v19 = vpop.f32.mrb[1].mxu0 }
  0xdb   :  { %v126_v21 = vadd.f32 %v125_v19, %v51_v16  ;;  %v359_v22 = vpop.f32.mrb[2].mxu0 }
  0xdc   :  { %v137_v24 = vadd.f32 %v359_v22, %v66_v20  ;;  %v128_v25 = vpop.f32.mrb[3].mxu0  ;;  %v142_v27 = vmax.f32 %v134_v18, 0.0 }
  0xdd   :  { %v129_v26 = vadd.f32 %v128_v25, %v56_v23  ;;  %v140_v29 = vmax.f32 %v126_v21, 0.0 }
  0xde   :  { %v143_v28 = vmax.f32 %v137_v24, 0.0 }
  0xdf   :  { %v141_v30 = vmax.f32 %v129_v26, 0.0 }
  0xe0   :  { %v149_v31 = vpack.c.bf16 %v143_v28, %v142_v27 }
  0xe1   :  { %v148_v32 = vpack.c.bf16 %v141_v30, %v140_v29 }
  0xe3   :  { %360 = vmatprep.subr.bf16.mxu1 %v148_v32 }
  0xe4   :  { %361 = vmatpush3.bf16.msra.mxu1 %v148_v32 }
  0xe5   :  { %362 = vmatprep.subr.bf16.mxu1 %v149_v31 }
  0xe8   :  { %363 = vmatpush3.bf16.msra.mxu1 %v149_v31 }
  0xeb   :  { %365 = vmatmul.mubr.msk.bf16.vlgmr.msra.gmra.mrb[0].mxu1 %vm184_vm1, %v386_v33 }
 0x1be   :  { %v366_v38 = vpop.f32.mrb[0].mxu1 }
 0x1bf   :  { %v234_v39 = vadd.f32 %v366_v38, %v167_v37  ;;  %v225_v40 = vpop.f32.mrb[1].mxu1 }
 0x1c0   :  { %v226_v42 = vadd.f32 %v225_v40, %v157_v35  ;;  %v367_v43 = vpop.f32.mrb[2].mxu1 }
 0x1c1   :  { %v237_v44 = vadd.f32 %v367_v43, %v172_v41  ;;  %v228_v45 = vpop.f32.mrb[3].mxu1  ;;  %v242_v47 = vmax.f32 %v234_v39, 0.0 }
 0x1c2   :  { %v229_v46 = vadd.f32 %v228_v45, %v162_v36  ;;  %v240_v49 = vmax.f32 %v226_v42, 0.0 }
 0x1c3   :  { %v243_v48 = vmax.f32 %v237_v44, 0.0 }
 0x1c4   :  { %v241_v50 = vmax.f32 %v229_v46, 0.0 }
 0x1c5   :  { %v246_v51 = vpack.c.bf16 %v243_v48, %v242_v47 }
 0x1c6   :  { %v245_v52 = vpack.c.bf16 %v241_v50, %v240_v49 }
 0x1c8   :  { %369 = vmatpush3.bf16.msra.mxu0 %v245_v52 }
 0x1c9   :  { %370 = vmatprep.subr.bf16.mxu0 %v412_v34 }
 0x1cc   :  { %371 = vmatpush3.bf16.msra.mxu0 %v246_v51 }
 0x1cf   :  { %373 = vmatmul.mubr.msk.bf16.vlgmr.msra.gmra.mrb[4].mxu0 %vm184_vm1, %v244_v53 }
 0x2a2   :  { %v290_v4 = vpop.f32.mrb[4].mxu0 }
 0x2a3   :  { %v291_v6 = vadd.f32 %v290_v4, %v251_v3  ;;  %v374_v7 = vpop.f32.mrb[5].mxu0 }
 0x2a4   :  { %v293_v8 = vpop.f32.mrb[6].mxu0 }
 0x2a5   :  { %v304_v9 = vadd.f32 %v303_v5, %v291_v6  ;;  %v375_v10 = vpop.f32.mrb[7].mxu0 }
 0x2a7   :  { %318 = vst [vmem:[#allocation3] sm:$0xf] %v304_v9 }
 0x2a8   :  { %398 = shalt.err (!%p395_p4)
}
 0x2a9   :  { %s399_s23 = scalar_lea.hbm %s549_s10, 128 }
 0x2aa   :  { %p400_p5 = scmp.ne.s32.totalorder %s549_s10, %s399_s23  ;;  %p403_p6 = scmp.lt.u32.totalorder %s399_s23, %s549_s10 }
 0x2ac   :  { %p405_p7 = pnand %p403_p6, %p400_p5 }
 0x2ae   :  { %408 = shalt.err (!%p405_p7)
}
 0x2af   :  { %329 = dma.vmem_to_hbm [thread:$0]  %s327_s9, 128, %s549_s10, [#allocation4]  }
 0x2b0   :  { %409 = dma.done.wait [#allocation4], 128  }
 0x2b1   :  { %410 = vsyncadd [#allocation4], 4294967168 }
 0x2b2   :  { %333 = vsyncpa [#allocation4], 1 }

</bundles_post_ra>
